<compile_context>
chip_gen: v5e
topology: v5e:2x2
jax: 0.10.0
libtpu: 0.0.40
codegen_flags: <defaults>
</compile_context>

<pallas_src>
import jax
import jax.numpy as jnp
from jax.experimental import pallas as pl
from jax.experimental.pallas import tpu as pltpu

_MiB = 1024 * 1024


def _copy_kernel(x_ref, o_ref):
    # Identity copy of the current lane-dense block.
    o_ref[...] = x_ref[...]


def _sublane_min(dtype) -> int:
    # f32 -> 8, bf16/f16 -> 16, int8/fp8 -> 32 (packed-sublane tiling minimum).
    itemsize = jnp.dtype(dtype).itemsize
    return max(8, 32 // max(1, itemsize))


def _pick_lane_cols(total: int):
    # Largest lane-dense column count (multiple of 128) that divides the flat size.
    for c in (4096, 2048, 1024, 512, 256, 128):
        if total % c == 0:
            return c
    return None


def _device_budgets():
    """(block_budget_bytes, vmem_limit_bytes) tuned per TPU generation."""
    try:
        cap = pltpu.get_tpu_info().vmem_capacity_bytes
    except Exception:
        cap = None
    if cap is not None and cap <= 64 * _MiB:
        # v7x: 64 MiB per-TC VMEM, ~3.2 TB/s HBM -> 8 MiB blocks, 40 MiB scoped.
        return 8 * _MiB, 40 * _MiB
    # v5e / v6e: 128 MiB physical VMEM -> 16 MiB blocks, 64 MiB scoped limit.
    # The explicit limit must never be dropped (v5e default scoped VMEM = 16 MiB).
    return 16 * _MiB, 64 * _MiB


def _pick_row_tile(rows: int, cols: int, itemsize: int, sub: int,
                   budget_bytes: int) -> int:
    # Largest multiple of the sublane minimum that fits the VMEM block budget.
    # Does NOT need to divide `rows`: the grid uses pl.cdiv and Pallas masks
    # the partial trailing block.
    bytes_per_row = cols * itemsize
    max_rows = max(1, budget_bytes // bytes_per_row)
    if max_rows >= rows:
        return rows                       # whole slab in one block (full extent)
    tile = (max_rows // sub) * sub
    if tile == 0:
        tile = min(sub, rows)
    return tile


def view_forward(x, o: int, *, materialize: bool = False,
                 block_budget_bytes: int | None = None):
    """Pallas implementation of View(o): returns x reshaped to (-1, o).

    materialize=False (default): metadata-only reshape — the fastest possible
    implementation, matching torch's .view() aliasing semantics.
    materialize=True: lane-dense Pallas copy into a fresh buffer.
    """
    total = x.size
    assert total % o == 0, f"numel {total} not divisible by o={o}"
    m = total // o

    if not materialize:
        # Free reshape: no HBM traffic at all. No copy can beat this.
        return jnp.reshape(x, (m, o))

    dtype = x.dtype
    itemsize = jnp.dtype(dtype).itemsize
    sub = _sublane_min(dtype)

    default_budget, vmem_limit = _device_budgets()
    if block_budget_bytes is None:
        block_budget_bytes = default_budget
    else:
        vmem_limit = max(vmem_limit, 4 * block_budget_bytes + 2 * _MiB)

    cost = pl.CostEstimate(flops=0, transcendentals=0,
                           bytes_accessed=2 * total * itemsize)

    cols = _pick_lane_cols(total)
    if cols is not None:
        rows = total // cols
        tile_r = _pick_row_tile(rows, cols, itemsize, sub, block_budget_bytes)
        # Layout glue: flatten to a lane-dense slab (free for contiguous x).
        slab = jnp.reshape(x, (rows, cols))
        grid = (pl.cdiv(rows, tile_r),)
        out = pl.pallas_call(
            _copy_kernel,
            out_shape=jax.ShapeDtypeStruct((rows, cols), dtype),
            grid_spec=pltpu.PrefetchScalarGridSpec(
                num_scalar_prefetch=0,
                grid=grid,
                in_specs=[pl.BlockSpec((tile_r, cols), lambda i: (i, 0))],
                out_specs=pl.BlockSpec((tile_r, cols), lambda i: (i, 0)),
            ),
            compiler_params=pltpu.CompilerParams(
                dimension_semantics=("parallel",),
                vmem_limit_bytes=vmem_limit,
            ),
            cost_estimate=cost,
        )(slab)
        # Final logical shape is metadata-only.
        return jnp.reshape(out, (m, o))

    # Flat size is not a multiple of 128: no lane-dense tiling exists.
    if total * itemsize <= block_budget_bytes:
        # Single full-extent (1, total) block: lane-dense except the tail vreg,
        # and full-extent dims are exempt from the (8, 128) constraint.
        slab = jnp.reshape(x, (1, total))
        out = pl.pallas_call(
            _copy_kernel,
            out_shape=jax.ShapeDtypeStruct((1, total), dtype),
            grid_spec=pltpu.PrefetchScalarGridSpec(
                num_scalar_prefetch=0,
                grid=(1,),
                in_specs=[pl.BlockSpec((1, total), lambda i: (0, 0))],
                out_specs=pl.BlockSpec((1, total), lambda i: (0, 0)),
            ),
            compiler_params=pltpu.CompilerParams(
                vmem_limit_bytes=vmem_limit,
            ),
            cost_estimate=cost,
        )(slab)
        return jnp.reshape(out, (m, o))

    # TODO(synk): huge inputs whose flat size is not a multiple of 128 have no
    # lane-dense tiling; View is metadata-only, so defer to XLA's free reshape.
    return jnp.reshape(x, (m, o))


if __name__ == "__main__":
    key = jax.random.PRNGKey(0)

    # Small NCHW-like feature map, consistent with a typical flattening View.
    x = jax.random.normal(key, (2, 4, 16, 16), dtype=jnp.float32)
    o = 32  # View(32): (2,4,16,16) -> (-1, 32) == (64, 32)
    ref = jnp.reshape(x, (-1, o))

    # Default path: metadata-only reshape (matches torch .view semantics).
    y_view = jax.block_until_ready(view_forward(x, o))
    assert y_view.shape == ref.shape and y_view.dtype == ref.dtype
    assert bool(jnp.all(y_view == ref))

    # Materializing Pallas copy path (fresh buffer), lane-dense slab copy.
    y = jax.block_until_ready(view_forward(x, o, materialize=True))
    assert y.shape == ref.shape and y.dtype == ref.dtype
    assert bool(jnp.all(y == ref))

    # Sub-32-bit dtype exercises the dtype-aware sublane path.
    xb = x.astype(jnp.bfloat16)
    yb = jax.block_until_ready(view_forward(xb, o, materialize=True))
    refb = jnp.reshape(xb, (-1, o))
    assert yb.shape == refb.shape and yb.dtype == refb.dtype
    assert bool(jnp.all(yb == refb))

    # Awkward row count + tiny block budget: exercises the pl.cdiv grid with a
    # partial trailing row tile (rows=33, tile=8 -> 5 grid steps, last masked).
    x2 = jax.random.normal(jax.random.PRNGKey(1), (264, 256), dtype=jnp.float32)
    y2 = jax.block_until_ready(
        view_forward(x2, o, materialize=True, block_budget_bytes=8 * 2048 * 4))
    ref2 = jnp.reshape(x2, (-1, o))
    assert y2.shape == ref2.shape and bool(jnp.all(y2 == ref2))

    print("KERNEL_OK")
</pallas_src>

<mosaic_0001>
module attributes {stable_mosaic.version = 11 : i64} {
  func.func @_copy_kernel(%arg0: i32, %arg1: memref<1x2048xf32, #tpu.memory_space<vmem>>, %arg2: memref<1x2048xf32, #tpu.memory_space<vmem>>) attributes {dimension_semantics = [#tpu.dimension_semantics<parallel>], iteration_bounds = array<i64: 1>, scalar_prefetch = 0 : i64, scratch_operands = 0 : i64, tpu.core_type = #tpu.core_type<tc>, window_params = [{transform_indices = @transform_0, window_bounds = array<i64: 1, 2048>}, {transform_indices = @transform_1, window_bounds = array<i64: 1, 2048>}]} {
    %c0 = arith.constant 0 : index
    %c0_0 = arith.constant 0 : index
    %0 = vector.load %arg1[%c0, %c0_0] : memref<1x2048xf32, #tpu.memory_space<vmem>>, vector<1x2048xf32>
    %c0_1 = arith.constant 0 : index
    %c0_2 = arith.constant 0 : index
    %1 = vector.load %arg2[%c0_1, %c0_2] : memref<1x2048xf32, #tpu.memory_space<vmem>>, vector<1x2048xf32>
    tpu.vector_store %arg2[%c0_1, %c0_2], %0 {strides = array<i32>} : memref<1x2048xf32, #tpu.memory_space<vmem>>, vector<1x2048xf32>,
    return
  }
  func.func @transform_0(%arg0: i32) -> (i32, i32) {
    %c0_i32 = arith.constant 0 : i32
    %c0_i32_0 = arith.constant 0 : i32
    return %arg0, %c0_i32 : i32, i32
  }
  func.func @transform_1(%arg0: i32) -> (i32, i32) {
    %c0_i32 = arith.constant 0 : i32
    %c0_i32_0 = arith.constant 0 : i32
    return %arg0, %c0_i32 : i32, i32
  }
}

</mosaic_0001>

<bundles_post_ra>
// kernel: tpu_custom_call.1
= control target key start
LH: loop header
LB: loop body
LE: loop exit
PB: predicated region body
PF: predicated region fallthrough
CT: control target
= control target key end

     0   :  { %6 = vsyncpa [#allocation3], 0  ;;  %s116_s0 = inlined_call_operand.hbm [shape: f32[1,2048], index: 0, kind: input, shape index: {}]   ;;  %s117_s1 = inlined_call_operand.hbm [shape: f32[1,2048], index: 1, kind: output, shape index: {}]  }
   0x1   :  { %7 = vsyncpa [#allocation4], 0  ;;  %s13_s8 = sshll.u32 %s116_s0, 4  ;;  %s98_s9 = smov [#allocation2]   ;;  %s14_s8 = int_to_ptr.hbm [resolvable:$true] %s13_s8 }
   0x2   :  { %s15_s10 = sshll.u32 %s98_s9, 4  ;;  %s16_s10 = int_to_ptr.vmem [resolvable:$true] %s15_s10 }
   0x3   :  { %18 = dma.hbm_to_vmem [thread:$0]  %s14_s8, 256, %s16_s10, [#allocation3]  }
   0x4   :  { %94 = dma.done.wait [#allocation3], 256  }
   0x5   :  { %95 = vsyncadd [#allocation3], 4294967040  ;;  %s99_s11 = smov [#allocation5]   ;;  %s34_s15 = sshll.u32 %s117_s1, 4  ;;  %v23_v0 = vld [vmem:[#allocation2] sm:$0xff]  ;;  %v24_v1 = vld [vmem:[#allocation2 + $0x8] sm:$0xff]  ;;  %s35_s15 = int_to_ptr.hbm [resolvable:$true] %s34_s15 }
   0x6   :  { %s32_s12 = sshll.u32 %s99_s11, 4  ;;  %25 = vst [vmem:[#allocation5] sm:$0xff] %v23_v0  ;;  %s33_s12 = int_to_ptr.vmem [resolvable:$true] %s32_s12 }
   0x7   :  { %26 = vst [vmem:[#allocation5 + $0x8] sm:$0xff] %v24_v1 }
   0x8   :  { %37 = dma.vmem_to_hbm [thread:$0]  %s33_s12, 256, %s35_s15, [#allocation4]  }
   0x9   :  { %96 = dma.done.wait [#allocation4], 256  }
   0xa   :  { %97 = vsyncadd [#allocation4], 4294967040 }
   0xb   :  { %42 = vsyncpa [#allocation3], 1 }
   0xc   :  { %43 = vsyncpa [#allocation4], 1 }

</bundles_post_ra>
